<compile_context>
chip_gen: v7x
topology: tpu7x:2x2x1
jax: 0.10.0
libtpu: 0.0.40
codegen_flags: <defaults>
</compile_context>

<pallas_src>
import functools

import jax
import jax.numpy as jnp
from jax.experimental import pallas as pl
from jax.experimental.pallas import tpu as pltpu


# ----------------------------------------------------------------------------
# tiling helpers
# ----------------------------------------------------------------------------
_MAX_TK = 2304  # largest single-step K tile: keeps bf16 tiles ~12 MiB double-buffered


def _round_up(x, m):
    return ((x + m - 1) // m) * m


def _k_padding(P, C):
    """K = P*C (patch planes x channels) -> lane-aligned K_pad, plus how many whole
    zero patch-planes realise it (so the pad fuses into the im2col stack)."""
    K = P * C
    K_pad = _round_up(K, 128)
    extra = K_pad - K
    pad_p = extra // C if extra % C == 0 else 0
    return K, K_pad, pad_p


def _k_tiling(K_pad):
    """Single k-step whenever the whole (128-aligned) K fits one tile; else split."""
    if K_pad <= _MAX_TK:
        return K_pad, 1
    n_k = -(-K_pad // _MAX_TK)
    while K_pad % (n_k * 128) != 0:        # tk must divide K_pad and be 128-aligned
        n_k += 1
    return K_pad // n_k, n_k


def _m_tiling(M):
    """bf16-friendly M tile (multiple of 16); keep >=2 parallel tiles for v7x's 2 TCs."""
    M16 = _round_up(M, 16)
    if M16 > 512:
        return 512
    if M16 >= 32:
        return _round_up((M16 + 1) // 2, 16)   # at least two M tiles
    return M16                                  # tiny (toy deep layers): one 16-row tile


# ----------------------------------------------------------------------------
# Pallas kernels
# ----------------------------------------------------------------------------
def _conv_kernel(*refs, relu, has_residual, n_k):
    """Tiled (patches @ w_scalefolded) with fused +bias (+residual)(+ReLU) epilogue.

    Single-k layers compute directly into the output tile (no scratch); multi-k layers
    use an f32 VMEM accumulator with init at k==0 and epilogue at k==last."""
    if has_residual:
        x_ref, w_ref, b_ref, r_ref, o_ref, *rest = refs
    else:
        x_ref, w_ref, b_ref, o_ref, *rest = refs
        r_ref = None
    acc_ref = rest[0] if rest else None

    def epilogue(acc):
        y = acc + b_ref[...]
        if has_residual:
            y = y + r_ref[...].astype(jnp.float32)
        if relu:
            y = jnp.maximum(y, 0.0)
        o_ref[...] = y.astype(o_ref.dtype)

    if n_k == 1:
        epilogue(jnp.dot(x_ref[...], w_ref[...], preferred_element_type=jnp.float32))
    else:
        @pl.when(pl.program_id(1) == 0)
        def _init():
            acc_ref[...] = jnp.zeros_like(acc_ref)

        acc_ref[...] += jnp.dot(x_ref[...], w_ref[...],
                                preferred_element_type=jnp.float32)

        @pl.when(pl.program_id(1) == pl.num_programs(1) - 1)
        def _final():
            epilogue(acc_ref[...])


def _maxpool_kernel(ee_ref, eo_ref, oe_ref, oo_ref, o_ref, *, Ho, Wo, C):
    """3x3/stride2/pad1 max over 4 stride-2 parity planes.

    Planes are laid out as (rows, W*C) so the lane dim is a multiple of 128 and the
    output store is unmasked; W-shifts become static lane-offset (C) slices."""
    WC = Wo * C
    ee = ee_ref[0]                          # (Ho+1, (Wo+1)*C)
    eo = eo_ref[0]                          # (Ho+1,  Wo   *C)
    oe = oe_ref[0]                          # (Ho,   (Wo+1)*C)
    oo = oo_ref[0]                          # (Ho,    Wo   *C)
    m = jnp.maximum(ee[:Ho, :WC], ee[:Ho, C:C + WC])
    m = jnp.maximum(m, ee[1:Ho + 1, :WC])
    m = jnp.maximum(m, ee[1:Ho + 1, C:C + WC])
    m = jnp.maximum(m, eo[:Ho, :])
    m = jnp.maximum(m, eo[1:Ho + 1, :])
    m = jnp.maximum(m, oe[:, :WC])
    m = jnp.maximum(m, oe[:, C:C + WC])
    m = jnp.maximum(m, oo)
    o_ref[0] = m.astype(o_ref.dtype)


# ----------------------------------------------------------------------------
# wrappers
# ----------------------------------------------------------------------------
def _im2col(x, kh, kw, stride, pad):
    """x: (N, H, W, C) NHWC -> patches (N*Ho*Wo, K_pad), K ordered (kh, kw, C).

    K is padded to a multiple of 128; whenever possible the padding is expressed as
    extra zero patch-planes so it fuses into the stack (no second HBM copy)."""
    N, H, W, C = x.shape
    Ho = (H + 2 * pad - kh) // stride + 1
    Wo = (W + 2 * pad - kw) // stride + 1
    xp = jnp.pad(x, ((0, 0), (pad, pad), (pad, pad), (0, 0))) if pad else x
    cols = [xp[:, di:di + stride * Ho:stride, dj:dj + stride * Wo:stride, :]
            for di in range(kh) for dj in range(kw)]
    P = kh * kw
    _, K_pad, pad_p = _k_padding(P, C)
    cols += [jnp.zeros_like(cols[0])] * pad_p
    p = jnp.stack(cols, axis=3).reshape(N * Ho * Wo, (P + pad_p) * C)
    if p.shape[1] != K_pad:                          # conv1 only: 147 -> 256 flat pad
        p = jnp.pad(p, ((0, 0), (0, K_pad - p.shape[1])))
    return p, Ho, Wo


def conv_bn(x, pw, *, stride, pad, relu, residual=None, out_dtype=jnp.bfloat16):
    """Conv2d (no bias) + folded BatchNorm + optional residual/ReLU, NHWC in/out.

    pw: packed weights from _pack_conv: {"w": (K_pad, Cout) bf16 with BN scale folded,
        "b": (1, Cout) f32, "kh", "kw"}."""
    N = x.shape[0]
    K_pad, Cout = pw["w"].shape
    patches, Ho, Wo = _im2col(x.astype(jnp.bfloat16), pw["kh"], pw["kw"], stride, pad)
    M = patches.shape[0]
    assert patches.shape[1] == K_pad, (patches.shape, K_pad)

    # Tiny-M guard (only triggers on toy inputs; real images have M >= 49): keep at
    # least one full 16-row bf16 sublane tile.  Larger M uses ragged last tiles.
    Mp = max(M, 16)
    if Mp != M:
        patches = jnp.pad(patches, ((0, Mp - M), (0, 0)))

    tk, n_k = _k_tiling(K_pad)
    tm = _m_tiling(Mp)
    n_m = -(-Mp // tm)

    inputs = [patches, pw["w"], pw["b"]]
    if residual is not None:
        r = residual.astype(jnp.bfloat16).reshape(M, Cout)
        if Mp != M:
            r = jnp.pad(r, ((0, Mp - M), (0, 0)))
        inputs.append(r)

    cparams = pltpu.CompilerParams(
        dimension_semantics=("parallel",) if n_k == 1 else ("parallel", "arbitrary"),
        vmem_limit_bytes=32 * 1024 * 1024)
    cost = pl.CostEstimate(
        flops=2 * Mp * K_pad * Cout, transcendentals=0,
        bytes_accessed=(Mp * K_pad + K_pad * Cout + 2 * Mp * Cout) * 2)

    if n_k == 1:
        grid = (n_m,)
        x_spec = pl.BlockSpec((tm, K_pad), lambda i: (i, 0))
        w_spec = pl.BlockSpec((K_pad, Cout), lambda i: (0, 0))
        b_spec = pl.BlockSpec((1, Cout), lambda i: (0, 0))
        io_spec = pl.BlockSpec((tm, Cout), lambda i: (i, 0))
        scratch = []
    else:
        grid = (n_m, n_k)
        x_spec = pl.BlockSpec((tm, tk), lambda i, k: (i, k))
        w_spec = pl.BlockSpec((tk, Cout), lambda i, k: (k, 0))
        b_spec = pl.BlockSpec((1, Cout), lambda i, k: (0, 0))
        io_spec = pl.BlockSpec((tm, Cout), lambda i, k: (i, 0))
        scratch = [pltpu.VMEM((tm, Cout), jnp.float32)]

    in_specs = [x_spec, w_spec, b_spec]
    if residual is not None:
        in_specs.append(io_spec)

    out = pl.pallas_call(
        functools.partial(_conv_kernel, relu=relu,
                          has_residual=residual is not None, n_k=n_k),
        grid=grid,
        in_specs=in_specs,
        out_specs=io_spec,
        out_shape=jax.ShapeDtypeStruct((Mp, Cout), out_dtype),
        scratch_shapes=scratch,
        compiler_params=cparams,
        cost_estimate=cost,
    )(*inputs)
    return out[:M].reshape(N, Ho, Wo, Cout)


def maxpool3x3s2p1(x):
    """MaxPool2d(kernel_size=3, stride=2, padding=1), NHWC, lane-dense output."""
    N, H, W, C = x.shape
    Ho = (H + 2 - 3) // 2 + 1
    Wo = (W + 2 - 3) // 2 + 1
    xp = jnp.pad(x, ((0, 0), (1, 1), (1, 1), (0, 0)), constant_values=-jnp.inf)
    # Stride-2 parity planes of the padded input, flattened to (rows, W*C).
    ee = xp[:, 0::2, 0::2, :][:, :Ho + 1, :Wo + 1, :].reshape(N, Ho + 1, (Wo + 1) * C)
    eo = xp[:, 0::2, 1::2, :][:, :Ho + 1, :Wo, :].reshape(N, Ho + 1, Wo * C)
    oe = xp[:, 1::2, 0::2, :][:, :Ho, :Wo + 1, :].reshape(N, Ho, (Wo + 1) * C)
    oo = xp[:, 1::2, 1::2, :][:, :Ho, :Wo, :].reshape(N, Ho, Wo * C)

    def spec(a):
        return pl.BlockSpec((1,) + a.shape[1:], lambda n: (n, 0, 0))

    out = pl.pallas_call(
        functools.partial(_maxpool_kernel, Ho=Ho, Wo=Wo, C=C),
        grid=(N,),
        in_specs=[spec(ee), spec(eo), spec(oe), spec(oo)],
        out_specs=pl.BlockSpec((1, Ho, Wo * C), lambda n: (n, 0, 0)),
        out_shape=jax.ShapeDtypeStruct((N, Ho, Wo * C), x.dtype),
        compiler_params=pltpu.CompilerParams(dimension_semantics=("parallel",)),
    )(ee, eo, oe, oo)
    return out.reshape(N, Ho, Wo, C)


# ----------------------------------------------------------------------------
# parameters: raw init (PyTorch layout) + one-time MXU packing
# ----------------------------------------------------------------------------
def _conv_init(key, cout, cin, k):
    std = (2.0 / (cin * k * k)) ** 0.5
    return std * jax.random.normal(key, (cout, cin, k, k), jnp.float32)


def _bn_init(key, c, eps=1e-5):
    k1, k2, k3, k4 = jax.random.split(key, 4)
    gamma = 1.0 + 0.1 * jax.random.normal(k1, (c,), jnp.float32)
    beta = 0.1 * jax.random.normal(k2, (c,), jnp.float32)
    mean = 0.1 * jax.random.normal(k3, (c,), jnp.float32)
    var = 1.0 + 0.1 * jax.random.uniform(k4, (c,), jnp.float32)
    scale = gamma / jnp.sqrt(var + eps)
    bias = beta - mean * scale
    return scale, bias


def init_params(key):
    keys = iter(jax.random.split(key, 64))
    nk = lambda: next(keys)
    params = {"conv1_w": _conv_init(nk(), 64, 3, 7), "bn1": _bn_init(nk(), 64),
              "layers": []}
    cfg = [(64, 64, 1), (64, 128, 2), (128, 256, 2), (256, 512, 2)]
    for (cin, cout, stride) in cfg:
        blocks = []
        for b in range(2):
            s = stride if b == 0 else 1
            ci = cin if b == 0 else cout
            blk = {"stride": s,
                   "conv1_w": _conv_init(nk(), cout, ci, 3), "bn1": _bn_init(nk(), cout),
                   "conv2_w": _conv_init(nk(), cout, cout, 3), "bn2": _bn_init(nk(), cout)}
            if s != 1 or ci != cout:
                blk["down_w"] = _conv_init(nk(), cout, ci, 1)
                blk["dbn"] = _bn_init(nk(), cout)
            blocks.append(blk)
        params["layers"].append(blocks)
    return params


def _pack_conv(w, scale, bias):
    """OIHW conv weight + folded BN -> MXU-ready (K_pad, Cout) bf16 with the BN scale
    folded into the weight columns (done once, not per forward)."""
    Cout, Cin, kh, kw = w.shape
    P = kh * kw
    _, K_pad, pad_p = _k_padding(P, Cin)
    wm = jnp.transpose(w, (2, 3, 1, 0)).reshape(P, Cin, Cout)
    if pad_p:
        wm = jnp.concatenate([wm, jnp.zeros((pad_p, Cin, Cout), wm.dtype)], axis=0)
    wm = (wm * scale[None, None, :]).reshape(-1, Cout)
    if wm.shape[0] != K_pad:                         # conv1: 147 -> 256 flat pad
        wm = jnp.pad(wm, ((0, K_pad - wm.shape[0]), (0, 0)))
    return {"w": wm.astype(jnp.bfloat16),
            "b": bias.reshape(1, Cout).astype(jnp.float32),
            "kh": kh, "kw": kw}


def pack_params(params):
    packed = {"conv1": _pack_conv(params["conv1_w"], *params["bn1"]), "layers": []}
    for blocks in params["layers"]:
        pb = []
        for blk in blocks:
            d = {"stride": blk["stride"],
                 "conv1": _pack_conv(blk["conv1_w"], *blk["bn1"]),
                 "conv2": _pack_conv(blk["conv2_w"], *blk["bn2"])}
            if "down_w" in blk:
                d["down"] = _pack_conv(blk["down_w"], *blk["dbn"])
            pb.append(d)
        packed["layers"].append(pb)
    return packed


# ----------------------------------------------------------------------------
# forward
# ----------------------------------------------------------------------------
def basic_block(x, blk):
    s = blk["stride"]
    identity = x
    out = conv_bn(x, blk["conv1"], stride=s, pad=1, relu=True)
    if "down" in blk:
        identity = conv_bn(x, blk["down"], stride=s, pad=0, relu=False)
    # conv2 + bn2 + residual add + relu fused into one Pallas epilogue
    return conv_bn(out, blk["conv2"], stride=1, pad=1, relu=True, residual=identity)


def feature_extraction_forward(image_nchw, packed):
    """ResNet18 with the final fc removed: output (N, 512, 1, 1), matching PyTorch."""
    x = jnp.transpose(image_nchw, (0, 2, 3, 1)).astype(jnp.float32)   # NCHW -> NHWC
    x = conv_bn(x, packed["conv1"], stride=2, pad=3, relu=True)
    x = maxpool3x3s2p1(x)
    for blocks in packed["layers"]:
        for blk in blocks:
            x = basic_block(x, blk)
    # AdaptiveAvgPool2d((1,1)) on a tiny tensor: plain jnp.mean per performance review.
    pooled = jnp.mean(x.astype(jnp.float32), axis=(1, 2))             # (N, 512)
    N, C = pooled.shape
    return pooled.reshape(N, C, 1, 1)                                 # back to NCHW


# ----------------------------------------------------------------------------
if __name__ == "__main__":
    key = jax.random.PRNGKey(0)
    kp, kx = jax.random.split(key)
    packed = pack_params(init_params(kp))
    x = jax.random.normal(kx, (2, 3, 32, 32), jnp.float32)   # small NCHW image batch
    out = feature_extraction_forward(x, packed)
    out = jax.block_until_ready(out)
    assert out.shape == (2, 512, 1, 1), out.shape
    assert bool(jnp.all(jnp.isfinite(out)))
    print("KERNEL_OK")
</pallas_src>

<mosaic_0001>
module attributes {stable_mosaic.version = 11 : i64} {
  func.func @_conv_kernel(%arg0: i32, %arg1: memref<256x256xbf16, #tpu.memory_space<vmem>>, %arg2: memref<256x64xbf16, #tpu.memory_space<vmem>>, %arg3: memref<1x64xf32, #tpu.memory_space<vmem>>, %arg4: memref<256x64xbf16, #tpu.memory_space<vmem>>) attributes {dimension_semantics = [#tpu.dimension_semantics<parallel>], iteration_bounds = array<i64: 2>, scalar_prefetch = 0 : i64, scratch_operands = 0 : i64, tpu.core_type = #tpu.core_type<tc>, window_params = [{transform_indices = @transform_0, window_bounds = array<i64: 256, 256>}, {pipeline_mode = #tpu.pipeline_mode<synchronous>, transform_indices = @transform_1, window_bounds = array<i64: 256, 64>}, {pipeline_mode = #tpu.pipeline_mode<synchronous>, transform_indices = @transform_2, window_bounds = array<i64: 1, 64>}, {transform_indices = @transform_3, window_bounds = array<i64: 256, 64>}]} {
    %c0 = arith.constant 0 : index
    %c0_0 = arith.constant 0 : index
    %0 = vector.load %arg1[%c0, %c0_0] : memref<256x256xbf16, #tpu.memory_space<vmem>>, vector<256x256xbf16>
    %c0_1 = arith.constant 0 : index
    %c0_2 = arith.constant 0 : index
    %1 = vector.load %arg2[%c0_1, %c0_2] : memref<256x64xbf16, #tpu.memory_space<vmem>>, vector<256x64xbf16>
    %cst = arith.constant dense<0.000000e+00> : vector<256x64xf32>
    %2 = tpu.matmul %0, %1, %cst {dimension_numbers = #tpu.dot_dimension_numbers<[1], [0], [0], [1], [0, 0, 1, 1], [], []>} : vector<256x256xbf16>, vector<256x64xbf16>, vector<256x64xf32> -> vector<256x64xf32>
    %c0_3 = arith.constant 0 : index
    %c0_4 = arith.constant 0 : index
    %3 = vector.load %arg3[%c0_3, %c0_4] : memref<1x64xf32, #tpu.memory_space<vmem>>, vector<1x64xf32>
    %4 = vector.broadcast %3 : vector<1x64xf32> to vector<256x64xf32>
    %5 = arith.addf %2, %4 : vector<256x64xf32>
    %cst_5 = arith.constant 0.000000e+00 : f32
    %6 = vector.broadcast %cst_5 : f32 to vector<256x64xf32>
    %7 = arith.maximumf %5, %6 : vector<256x64xf32>
    %8 = arith.truncf %7 : vector<256x64xf32> to vector<256x64xbf16>
    %c0_6 = arith.constant 0 : index
    %c0_7 = arith.constant 0 : index
    %9 = vector.load %arg4[%c0_6, %c0_7] : memref<256x64xbf16, #tpu.memory_space<vmem>>, vector<256x64xbf16>
    tpu.vector_store %arg4[%c0_6, %c0_7], %8 {strides = array<i32>} : memref<256x64xbf16, #tpu.memory_space<vmem>>, vector<256x64xbf16>,
    return
  }
  func.func @transform_0(%arg0: i32) -> (i32, i32) {
    %c0_i32 = arith.constant 0 : i32
    %c0_i32_0 = arith.constant 0 : i32
    return %arg0, %c0_i32 : i32, i32
  }
  func.func @transform_1(%arg0: i32) -> (i32, i32) {
    %c0_i32 = arith.constant 0 : i32
    %c0_i32_0 = arith.constant 0 : i32
    %c0_i32_1 = arith.constant 0 : i32
    return %c0_i32, %c0_i32_0 : i32, i32
  }
  func.func @transform_2(%arg0: i32) -> (i32, i32) {
    %c0_i32 = arith.constant 0 : i32
    %c0_i32_0 = arith.constant 0 : i32
    %c0_i32_1 = arith.constant 0 : i32
    return %c0_i32, %c0_i32_0 : i32, i32
  }
  func.func @transform_3(%arg0: i32) -> (i32, i32) {
    %c0_i32 = arith.constant 0 : i32
    %c0_i32_0 = arith.constant 0 : i32
    return %arg0, %c0_i32 : i32, i32
  }
}

</mosaic_0001>

<bundles_post_ra>
// kernel: tpu_custom_call.1
= control target key start
LH: loop header
LB: loop body
LE: loop exit
PB: predicated region body
PF: predicated region fallthrough
CT: control target
= control target key end

     0   :  { %8 = vsyncpa [#allocation3], 0  ;;  %s1686_s0 = inlined_call_operand.hbm [shape: bf16[512,256], index: 0, kind: input, shape index: {}]   ;;  %s1687_s1 = inlined_call_operand.vmem [shape: bf16[256,64], index: 1, kind: input, shape index: {}]   ;;  %s1688_s2 = inlined_call_operand.vmem [shape: f32[1,64], index: 2, kind: input, shape index: {}]   ;;  %s1689_s3 = inlined_call_operand.vmem [shape: bf16[512,64], index: 3, kind: output, shape index: {}]  }
   0x1   :  { %10 = vsyncpa [#allocation3 + $0x1], 0  ;;  %s1394_s12 = smov 0   ;;  %s1396_s13 = smov 0  }
   0x2   :  { %s1398_s14 = smov 0   ;;  %s1400_s15 = smov 0  }
   0x3 LB: > { %s943_s16 = sadd.s32 4294967295, %s1369_s15   ;;  %s1414_s17 = sadd.s32 1, %s1369_s15   ;;  %s1369_s15 = sphi %s1400_s15, %s1696_s15   ;;  %s1365_s14 = sphi %s1398_s14, %s1695_s14   ;;  %s1361_s13 = sphi %s1396_s13, %s1694_s13   ;;  %s1357_s12 = sphi %s1394_s12, %s1693_s12  }
   0x4   : > { %s20_s18 = ssub.s32 %s1369_s15, %s1414_s17  ;;  %s23_s19 = sadd.s32 1, %s1365_s14 }
   0x5   : > { %p21_p0 = scmp.eq.s32.totalorder %s20_s18, 0  ;;  %p30_p1 = scmp.ne.s32.totalorder %s1365_s14, %s1361_s13 }
   0x6   : > { %p31_p2 = scmp.eq.s32.totalorder %s1369_s15, 0  ;;  %p36_p3 = scmp.ne.s32.totalorder %s1361_s13, %s1357_s12 }
   0x7   : > { %s1424_s20 = scalar_select %p21_p0, %s1365_s14, %s23_s19  }
   0x8   : > { %p32_p4 = por %p31_p2, %p30_p1  ;;  %p37_p5 = scmp.eq.s32.totalorder %s943_s16, 0 }
   0x9   : > { %p1206_p6 = scmp.lt.s32.totalorder %s1369_s15, 2  ;;  %s134_s22 = sand.u32 1, %s1365_s14  }
   0xa   : > { %p1429_p7 = por %p37_p5, %p36_p3  ;;  %s947_s23 = sshll.u32 %s134_s22, 8 }
   0xb   : > { %s1039_s24 = sshll.u32 %s1369_s15, 12  ;;  %s138_s28 = scalar_lea.vmem [#allocation2], %s947_s23 }
   0xc   : > { %s1438_s27 = scalar_lea.hbm %s1686_s0, %s1039_s24  ;;  %s146_s29 = sshll.u32 %s138_s28, 4  ;;  %s1440_s29 = int_to_ptr.vmem [resolvable:$true] %s146_s29 }
   0xd   : > { %p1442_p8 = pnand %p1206_p6, %p32_p4  ;;  %s1447_s4 = scalar_lea.sflag [#allocation3], %s134_s22 }
   0xe   : > { %s1305_s5 = scalar_lea.hbm %s1438_s27, 4096  ;;  %s1310_s8 = scalar_lea.hbm %s1686_s0, 8192 }
   0xf   : > { %p1306_p10 = scmp.ne.s32.totalorder %s1438_s27, %s1305_s5  ;;  %p1307_p11 = pneg %p1442_p8 }
  0x10   : > { %p1311_p0 = scmp.lt.u32.totalorder %s1438_s27, %s1686_s0  ;;  %p1312_p1 = scmp.lt.u32.totalorder %s1310_s8, %s1305_s5 }
  0x11   : > { %p1308_p12 = pnand %p1307_p11, %p1306_p10  ;;  %p1314_p3 = scmp.lt.u32.totalorder %s1305_s5, %s1438_s27 }
  0x12   : > { %p1313_p2 = por %p1312_p1, %p1311_p0 }
  0x13   : > { %p1309_p13 = pneg %p1308_p12 }
  0x14   : > { %p1315_p4 = por %p1314_p3, %p1313_p2 }
  0x16   : > { %p1316_p5 = pnand %p1315_p4, %p1309_p13 }
  0x18   : > { %1319 = shalt.err (!%p1316_p5)
}
  0x19   : > { %s1320_s11 = scalar_lea.vmem %s1440_s29, 4096  ;;  %s1371_s12 = smov [#allocation2]  }
  0x1a   : > { %p1321_p6 = scmp.ne.s32.totalorder %s1440_s29, %s1320_s11  ;;  %s1325_s18 = sshll.u32 %s1371_s12, 4  ;;  %s1326_s18 = int_to_ptr.vmem [resolvable:$false] %s1325_s18 }
  0x1b   : > { %s1327_s19 = scalar_lea.vmem %s1326_s18, 8192  ;;  %p1328_p9 = scmp.lt.s32.totalorder %s1440_s29, %s1326_s18 }
  0x1c   : > { %p1323_p10 = pnand %p1321_p6, %p1307_p11  ;;  %p1329_p0 = scmp.lt.s32.totalorder %s1327_s19, %s1320_s11 }
  0x1e   : > { %p1324_p12 = pneg %p1323_p10  ;;  %p1330_p1 = por %p1329_p0, %p1328_p9 }
  0x20   : > { %p1331_p2 = pnand %p1330_p1, %p1324_p12 }
  0x22   : > { %1334 = shalt.err (!%p1331_p2)
}
  0x23   : > { %s1372_s22 = smov 128   ;;  %s1373_s23 = smov 8  }
  0x24   : > { %1205 = dma.hbm_to_vmem [thread:$0]  (!%p1442_p8), %s1438_s27, 4096, %s1440_s29, %s1447_s4, %s1372_s22, %s1372_s22, %s1373_s23  }
  0x25   : > { %p154_p11 = scmp.lt.s32.totalorder %s1369_s15, 3  ;;  %p1692_p13 = scmp.ge.s32.totalorder %s1369_s15, 1 }
  0x27   : > { %p155_p3 = pnand %p1692_p13, %p154_p11 }
  0x28   : > { %s160_s24 = sand.u32 (!%p155_p3), 1, %s1361_s13  }
  0x29   : > { %158 = sbr.rel (%p155_p3) target bundleno = 362 (0x16a), region = 32  ;;  %s952_s25 = sshll.u32 (!%p155_p3), %s160_s24, 8 }
  0x2a   : > { %s161_s26 = scalar_lea.sflag (!%p155_p3), [#allocation3], %s160_s24  ;;  %s1479_s28 = scalar_lea.vmem (!%p155_p3), [#allocation2], %s952_s25 }
  0x30   : > { %1352 = dma.done.wait (%p1429_p7), %s161_s26, 4096  }
  0x31   : > { %1354 = vsyncadd (%p1429_p7), %s161_s26, 4294963200  ;;  %v1241_v0 = vld [vmem:[%s1687_s1 + $0x40] sm:$0xff]   ;;  %v1243_v2 = vld [vmem:[%s1687_s1 + $0x48] sm:$0xff]   ;;  %s953_s12 = sshll.u32 %s943_s16, 5  ;;  %vm843_vm0 = vcmask 519168  }
  0x32   : > { %v1242_v1 = vld [vmem:[%s1687_s1] sm:$0xff]   ;;  %1072 = vmatprep.subr.bf16.mxu0 %v1241_v0  ;;  %1184 = vmatprep.subr.bf16.mxu1 %v1241_v0  ;;  %v1244_v3 = vld [vmem:[%s1687_s1 + $0x8] sm:$0xff]   ;;  %v1245_v4 = vld [vmem:[%s1687_s1 + $0x50] sm:$0xff]   ;;  %p189_p7 = scmp.lt.s32.totalorder %s953_s12, 63 }
  0x33   : > { %1073 = vmatpush3.bf16.msra.mxu0 %v1242_v1  ;;  %1192 = vmatpush3.bf16.msra.mxu1 %v1242_v1  ;;  %v1246_v5 = vld [vmem:[%s1687_s1 + $0x10] sm:$0xff]   ;;  %v1247_v6 = vld [vmem:[%s1687_s1 + $0x58] sm:$0xff]   ;;  %v1249_v8 = vld [vmem:[%s1687_s1 + $0x60] sm:$0xff]  }
  0x34   : > { %1074 = vmatprep.subr.bf16.mxu0 %v1243_v2  ;;  %1185 = vmatprep.subr.bf16.mxu1 %v1243_v2  ;;  %v1248_v7 = vld [vmem:[%s1687_s1 + $0x18] sm:$0xff]   ;;  %v1250_v9 = vld [vmem:[%s1687_s1 + $0x20] sm:$0xff]   ;;  %v1251_v10 = vld [vmem:[%s1687_s1 + $0x68] sm:$0xff]   ;;  %s1698_s12 = smov (!%p189_p7, %s953_s12), 63 }
  0x35   : > { %v1259_v11 = vld [vmem:[%s1479_s28 + $0x4] ss:$8 sps:$4 sm:$0xff]   ;;  %v1253_v14 = vld [vmem:[%s1687_s1 + $0x70] sm:$0xff]   ;;  %v1255_v16 = vld [vmem:[%s1687_s1 + $0x78] sm:$0xff]  }
  0x36   : > { %v1262_v12 = vld [vmem:[%s1479_s28 + $0x84] ss:$8 sps:$4 sm:$0xff]   ;;  %554 = vmatprep.mubr.bf16.mxu0 %v1259_v11  ;;  %v1254_v15 = vld [vmem:[%s1687_s1 + $0x30] sm:$0xff]   ;;  %v1256_v17 = vld [vmem:[%s1687_s1 + $0x38] sm:$0xff]  }
  0x37   : > { %1075 = vmatpush3.bf16.msra.mxu0 %v1244_v3  ;;  %1193 = vmatpush3.bf16.msra.mxu1 %v1244_v3  ;;  %v1252_v13 = vld [vmem:[%s1687_s1 + $0x28] sm:$0xff]   ;;  %v1263_v20 = vld [vmem:[%s1479_s28 + $0x14] ss:$8 sps:$4 sm:$0xff]   ;;  %v1267_v22 = vld [vmem:[%s1479_s28 + $0x10] ss:$8 sps:$4 sm:$0xff]  }
  0x38   : > { %1076 = vmatprep.subr.bf16.mxu0 %v1245_v4  ;;  %1186 = vmatprep.subr.bf16.mxu1 %v1245_v4  ;;  %v1257_v18 = vld [vmem:[%s1479_s28] ss:$8 sps:$4 sm:$0xff]   ;;  %v1265_v21 = vld [vmem:[%s1479_s28 + $0x94] ss:$8 sps:$4 sm:$0xff]   ;;  %v1268_v23 = vld [vmem:[%s1479_s28 + $0x90] ss:$8 sps:$4 sm:$0xff]  }
  0x39   : > { %618 = vmatprep.mubr.bf16.mxu1 %v1262_v12  ;;  %v1260_v19 = vld [vmem:[%s1479_s28 + $0x80] ss:$8 sps:$4 sm:$0xff]   ;;  %v1269_v24 = vld [vmem:[%s1479_s28 + $0x24] ss:$8 sps:$4 sm:$0xff]   ;;  %v1275_v28 = vld [vmem:[%s1479_s28 + $0x34] ss:$8 sps:$4 sm:$0xff]  }
  0x3a   : > { %v1271_v25 = vld [vmem:[%s1479_s28 + $0xa4] ss:$8 sps:$4 sm:$0xff]   ;;  %v1273_v26 = vld [vmem:[%s1479_s28 + $0x20] ss:$8 sps:$4 sm:$0xff]   ;;  %v1277_v29 = vld [vmem:[%s1479_s28 + $0xb4] ss:$8 sps:$4 sm:$0xff]  }
  0x3b   : > { %1077 = vmatpush3.bf16.msra.mxu0 %v1246_v5  ;;  %1194 = vmatpush3.bf16.msra.mxu1 %v1246_v5  ;;  %v1274_v27 = vld [vmem:[%s1479_s28 + $0xa0] ss:$8 sps:$4 sm:$0xff]   ;;  %v1279_v30 = vld [vmem:[%s1479_s28 + $0x30] ss:$8 sps:$4 sm:$0xff]   ;;  %v1281_v32 = vld [vmem:[%s1479_s28 + $0x44] ss:$8 sps:$4 sm:$0xff]  }
  0x3c   : > { %1078 = vmatprep.subr.bf16.mxu0 %v1247_v6  ;;  %1187 = vmatprep.subr.bf16.mxu1 %v1247_v6  ;;  %v1280_v31 = vld [vmem:[%s1479_s28 + $0xb0] ss:$8 sps:$4 sm:$0xff]   ;;  %v1283_v33 = vld [vmem:[%s1479_s28 + $0xc4] ss:$8 sps:$4 sm:$0xff]   ;;  %v1285_v34 = vld [vmem:[%s1479_s28 + $0x40] ss:$8 sps:$4 sm:$0xff]  }
  0x3d   : > { %v1286_v35 = vld [vmem:[%s1479_s28 + $0xc0] ss:$8 sps:$4 sm:$0xff]   ;;  %v1287_v36 = vld [vmem:[%s1479_s28 + $0x54] ss:$8 sps:$4 sm:$0xff]   ;;  %v1291_v38 = vld [vmem:[%s1479_s28 + $0x50] ss:$8 sps:$4 sm:$0xff]  }
  0x3e   : > { %v1289_v37 = vld [vmem:[%s1479_s28 + $0xd4] ss:$8 sps:$4 sm:$0xff]   ;;  %v1292_v39 = vld [vmem:[%s1479_s28 + $0xd0] ss:$8 sps:$4 sm:$0xff]   ;;  %v1293_v40 = vld [vmem:[%s1479_s28 + $0x64] ss:$8 sps:$4 sm:$0xff]  }
  0x3f   : > { %1079 = vmatpush3.bf16.msra.mxu0 %v1248_v7  ;;  %1195 = vmatpush3.bf16.msra.mxu1 %v1248_v7  ;;  %v1295_v41 = vld [vmem:[%s1479_s28 + $0xe4] ss:$8 sps:$4 sm:$0xff]   ;;  %v1297_v42 = vld [vmem:[%s1479_s28 + $0x60] ss:$8 sps:$4 sm:$0xff]   ;;  %v1299_v44 = vld [vmem:[%s1479_s28 + $0x74] ss:$8 sps:$4 sm:$0xff]  }
  0x40   : > { %1080 = vmatprep.subr.bf16.mxu0 %v1249_v8  ;;  %1188 = vmatprep.subr.bf16.mxu1 %v1249_v8  ;;  %v1298_v43 = vld [vmem:[%s1479_s28 + $0xe0] ss:$8 sps:$4 sm:$0xff]   ;;  %v1301_v45 = vld [vmem:[%s1479_s28 + $0xf4] ss:$8 sps:$4 sm:$0xff]   ;;  %v1303_v46 = vld [vmem:[%s1479_s28 + $0x70] ss:$8 sps:$4 sm:$0xff]  }
  0x41   : > { %v1304_v47 = vld [vmem:[%s1479_s28 + $0xf0] ss:$8 sps:$4 sm:$0xff]   ;;  %v1570_v50 = vld [vmem:[%s1688_s2] ss:$0 sm:$0xff]  ;;  %s954_s28 = sshll.u32 %s1698_s12, 2 }
  0x42   : > { %s1579_s22 = scalar_lea.vmem %s1689_s3, %s954_s28 }
  0x43   : > { %1081 = vmatpush3.bf16.msra.mxu0 %v1250_v9  ;;  %1196 = vmatpush3.bf16.msra.mxu1 %v1250_v9 }
  0x44   : > { %1082 = vmatprep.subr.bf16.mxu0 %v1251_v10  ;;  %1189 = vmatprep.subr.bf16.mxu1 %v1251_v10 }
  0x47   : > { %1083 = vmatpush3.bf16.msra.mxu0 %v1252_v13  ;;  %1197 = vmatpush3.bf16.msra.mxu1 %v1252_v13 }
  0x48   : > { %1084 = vmatprep.subr.bf16.mxu0 %v1253_v14  ;;  %1190 = vmatprep.subr.bf16.mxu1 %v1253_v14 }
  0x4b   : > { %1085 = vmatpush3.bf16.msra.mxu0 %v1254_v15  ;;  %1198 = vmatpush3.bf16.msra.mxu1 %v1254_v15 }
  0x4c   : > { %1086 = vmatprep.subr.bf16.mxu0 %v1255_v16  ;;  %1191 = vmatprep.subr.bf16.mxu1 %v1255_v16 }
  0x4f   : > { %1087 = vmatpush3.bf16.msra.mxu0 %v1256_v17  ;;  %1199 = vmatpush3.bf16.msra.mxu1 %v1256_v17 }
  0x52   : > { %555 = vmatmul.mubr.bf16.vlgmr.msra.gmra.mrb[0].mxu0 %v1257_v18  ;;  %619 = vmatmul.mubr.bf16.vlgmr.msra.gmra.mrb[0].mxu1 %v1260_v19 }
  0x53   : > { %562 = vmatprep.mubr.bf16.mxu0 %v1263_v20  ;;  %626 = vmatprep.mubr.bf16.mxu1 %v1265_v21 }
  0x5a   : > { %563 = vmatmul.mubr.bf16.gmra.mrb[4].mxu0 %v1267_v22  ;;  %627 = vmatmul.mubr.bf16.gmra.mrb[4].mxu1 %v1268_v23 }
  0x5b   : > { %570 = vmatprep.mubr.bf16.mxu0 %v1269_v24  ;;  %634 = vmatprep.mubr.bf16.mxu1 %v1271_v25 }
  0x62   : > { %571 = vmatmul.mubr.bf16.gmra.mrb[8].mxu0 %v1273_v26  ;;  %635 = vmatmul.mubr.bf16.gmra.mrb[8].mxu1 %v1274_v27 }
  0x63   : > { %578 = vmatprep.mubr.bf16.mxu0 %v1275_v28  ;;  %642 = vmatprep.mubr.bf16.mxu1 %v1277_v29 }
  0x6a   : > { %579 = vmatmul.mubr.bf16.gmra.mrb[12].mxu0 %v1279_v30  ;;  %643 = vmatmul.mubr.bf16.gmra.mrb[12].mxu1 %v1280_v31 }
  0x6b   : > { %586 = vmatprep.mubr.bf16.mxu0 %v1281_v32  ;;  %650 = vmatprep.mubr.bf16.mxu1 %v1283_v33 }
  0x72   : > { %587 = vmatmul.mubr.bf16.gmra.mrb[16].mxu0 %v1285_v34  ;;  %651 = vmatmul.mubr.bf16.gmra.mrb[16].mxu1 %v1286_v35 }
  0x73   : > { %594 = vmatprep.mubr.bf16.mxu0 %v1287_v36  ;;  %658 = vmatprep.mubr.bf16.mxu1 %v1289_v37 }
  0x7a   : > { %595 = vmatmul.mubr.bf16.gmra.mrb[20].mxu0 %v1291_v38  ;;  %659 = vmatmul.mubr.bf16.gmra.mrb[20].mxu1 %v1292_v39 }
  0x7b   : > { %602 = vmatprep.mubr.bf16.mxu0 %v1293_v40  ;;  %666 = vmatprep.mubr.bf16.mxu1 %v1295_v41 }
  0x82   : > { %603 = vmatmul.mubr.bf16.gmra.mrb[24].mxu0 %v1297_v42  ;;  %667 = vmatmul.mubr.bf16.gmra.mrb[24].mxu1 %v1298_v43 }
  0x83   : > { %610 = vmatprep.mubr.bf16.mxu0 %v1299_v44  ;;  %674 = vmatprep.mubr.bf16.mxu1 %v1301_v45 }
  0x8a   : > { %611 = vmatmul.mubr.bf16.gmra.mrb[28].mxu0 %v1303_v46  ;;  %675 = vmatmul.mubr.bf16.gmra.mrb[28].mxu1 %v1304_v47 }
 0x125   : > { %v1088_v48 = vpop.f32.mrb[0].mxu0  ;;  %v1136_v49 = vpop.f32.mrb[0].mxu1 }
 0x126   : > { %v1089_v51 = vpop.f32.mrb[1].mxu0  ;;  %v1137_v52 = vpop.f32.mrb[1].mxu1 }
 0x127   : > { %v1090_v53 = vadd.f32 %v1089_v51, %v1088_v48  ;;  %v1138_v54 = vadd.f32 %v1137_v52, %v1136_v49  ;;  %v1091_v55 = vpop.f32.mrb[2].mxu0  ;;  %v1139_v56 = vpop.f32.mrb[2].mxu1 }
 0x128   : > { %v1092_v57 = vpop.f32.mrb[3].mxu0  ;;  %v1140_v58 = vpop.f32.mrb[3].mxu1 }
 0x129   : > { %v557_v59 = vadd.f32 %v1090_v53, %v1570_v50  ;;  %v621_v60 = vadd.f32 %v1138_v54, %v1570_v50  ;;  %v1093_v61 = vadd.f32 %v1092_v57, %v1091_v55  ;;  %v1141_v62 = vadd.f32 %v1140_v58, %v1139_v56 }
 0x12b   : > { %v683_v63 = vmax.f32 %v557_v59, 0.0  ;;  %v699_v0 = vmax.f32 %v621_v60, 0.0  ;;  %v560_v1 = vadd.f32 %v1093_v61, %v1570_v50  ;;  %v624_v2 = vadd.f32 %v1141_v62, %v1570_v50 }
 0x12d   : > { %v1040_v3 = vpack.c.bf16 %v683_v63, %v683_v63  ;;  %v1056_v4 = vpack.c.bf16 %v699_v0, %v699_v0  ;;  %v684_v5 = vmax.f32 %v560_v1, 0.0  ;;  %v700_v6 = vmax.f32 %v624_v2, 0.0  ;;  %v1094_v7 = vpop.f32.mrb[4].mxu0  ;;  %v1142_v8 = vpop.f32.mrb[4].mxu1 }
 0x12e   : > { %v1095_v9 = vpop.f32.mrb[5].mxu0  ;;  %v1143_v10 = vpop.f32.mrb[5].mxu1 }
 0x12f   : > { %844 = vst.msk [vmem:[%s1579_s22] sm:$0xf] %vm843_vm0, %v1040_v3  ;;  %860 = vst.msk [vmem:[%s1579_s22 + $0x40] sm:$0xf] %vm843_vm0, %v1056_v4  ;;  %v1041_v11 = vpack.c.bf16 %v684_v5, %v684_v5  ;;  %v1057_v12 = vpack.c.bf16 %v700_v6, %v700_v6  ;;  %v1096_v13 = vadd.f32 %v1095_v9, %v1094_v7  ;;  %v1097_v15 = vpop.f32.mrb[6].mxu0  ;;  %v1145_v16 = vpop.f32.mrb[6].mxu1 }
 0x130   : > { %v1144_v14 = vadd.f32 %v1143_v10, %v1142_v8  ;;  %v1098_v17 = vpop.f32.mrb[7].mxu0  ;;  %v1146_v18 = vpop.f32.mrb[7].mxu1 }
 0x131   : > { %845 = vst.msk [vmem:[%s1579_s22 + $0x4] sm:$0xf] %vm843_vm0, %v1041_v11  ;;  %861 = vst.msk [vmem:[%s1579_s22 + $0x44] sm:$0xf] %vm843_vm0, %v1057_v12  ;;  %v565_v19 = vadd.f32 %v1096_v13, %v1570_v50  ;;  %v1099_v21 = vadd.f32 %v1098_v17, %v1097_v15  ;;  %v1147_v22 = vadd.f32 %v1146_v18, %v1145_v16 }
 0x132   : > { %v629_v20 = vadd.f32 %v1144_v14, %v1570_v50 }
 0x133   : > { %v685_v23 = vmax.f32 %v565_v19, 0.0  ;;  %v568_v25 = vadd.f32 %v1099_v21, %v1570_v50  ;;  %v632_v26 = vadd.f32 %v1147_v22, %v1570_v50 }
 0x134   : > { %v701_v24 = vmax.f32 %v629_v20, 0.0 }
 0x135   : > { %v1042_v27 = vpack.c.bf16 %v685_v23, %v685_v23  ;;  %v686_v29 = vmax.f32 %v568_v25, 0.0  ;;  %v702_v30 = vmax.f32 %v632_v26, 0.0  ;;  %v1100_v31 = vpop.f32.mrb[8].mxu0  ;;  %v1148_v32 = vpop.f32.mrb[8].mxu1 }
 0x136   : > { %v1058_v28 = vpack.c.bf16 %v701_v24, %v701_v24  ;;  %v1101_v33 = vpop.f32.mrb[9].mxu0  ;;  %v1149_v34 = vpop.f32.mrb[9].mxu1 }
 0x137   : > { %846 = vst.msk [vmem:[%s1579_s22 + $0x8] sm:$0xf] %vm843_vm0, %v1042_v27  ;;  %v1043_v35 = vpack.c.bf16 %v686_v29, %v686_v29  ;;  %v1059_v36 = vpack.c.bf16 %v702_v30, %v702_v30  ;;  %v1102_v37 = vadd.f32 %v1101_v33, %v1100_v31  ;;  %v1150_v38 = vadd.f32 %v1149_v34, %v1148_v32  ;;  %v1103_v39 = vpop.f32.mrb[10].mxu0  ;;  %v1151_v40 = vpop.f32.mrb[10].mxu1 }
 0x138   : > { %862 = vst.msk [vmem:[%s1579_s22 + $0x48] sm:$0xf] %vm843_vm0, %v1058_v28  ;;  %v1104_v41 = vpop.f32.mrb[11].mxu0  ;;  %v1152_v42 = vpop.f32.mrb[11].mxu1 }
 0x139   : > { %847 = vst.msk [vmem:[%s1579_s22 + $0xc] sm:$0xf] %vm843_vm0, %v1043_v35  ;;  %863 = vst.msk [vmem:[%s1579_s22 + $0x4c] sm:$0xf] %vm843_vm0, %v1059_v36  ;;  %v573_v43 = vadd.f32 %v1102_v37, %v1570_v50  ;;  %v637_v44 = vadd.f32 %v1150_v38, %v1570_v50  ;;  %v1105_v45 = vadd.f32 %v1104_v41, %v1103_v39 }
 0x13a   : > { %v1153_v46 = vadd.f32 %v1152_v42, %v1151_v40 }
 0x13b   : > { %v687_v47 = vmax.f32 %v573_v43, 0.0  ;;  %v703_v48 = vmax.f32 %v637_v44, 0.0  ;;  %v576_v49 = vadd.f32 %v1105_v45, %v1570_v50 }
 0x13c   : > { %v640_v51 = vadd.f32 %v1153_v46, %v1570_v50 }
 0x13d   : > { %v1044_v52 = vpack.c.bf16 %v687_v47, %v687_v47  ;;  %v1060_v53 = vpack.c.bf16 %v703_v48, %v703_v48  ;;  %v688_v54 = vmax.f32 %v576_v49, 0.0  ;;  %v1106_v56 = vpop.f32.mrb[12].mxu0  ;;  %v1154_v57 = vpop.f32.mrb[12].mxu1 }
 0x13e   : > { %v704_v55 = vmax.f32 %v640_v51, 0.0  ;;  %v1107_v58 = vpop.f32.mrb[13].mxu0  ;;  %v1155_v59 = vpop.f32.mrb[13].mxu1 }
 0x13f   : > { %848 = vst.msk [vmem:[%s1579_s22 + $0x10] sm:$0xf] %vm843_vm0, %v1044_v52  ;;  %864 = vst.msk [vmem:[%s1579_s22 + $0x50] sm:$0xf] %vm843_vm0, %v1060_v53  ;;  %v1045_v60 = vpack.c.bf16 %v688_v54, %v688_v54  ;;  %v1108_v62 = vadd.f32 %v1107_v58, %v1106_v56  ;;  %v1156_v63 = vadd.f32 %v1155_v59, %v1154_v57  ;;  %v1109_v0 = vpop.f32.mrb[14].mxu0  ;;  %v1157_v1 = vpop.f32.mrb[14].mxu1 }
 0x140   : > { %v1061_v61 = vpack.c.bf16 %v704_v55, %v704_v55  ;;  %v1110_v2 = vpop.f32.mrb[15].mxu0  ;;  %v1158_v3 = vpop.f32.mrb[15].mxu1 }
 0x141   : > { %849 = vst.msk [vmem:[%s1579_s22 + $0x14] sm:$0xf] %vm843_vm0, %v1045_v60  ;;  %v581_v4 = vadd.f32 %v1108_v62, %v1570_v50  ;;  %v645_v5 = vadd.f32 %v1156_v63, %v1570_v50  ;;  %v1111_v6 = vadd.f32 %v1110_v2, %v1109_v0  ;;  %v1159_v7 = vadd.f32 %v1158_v3, %v1157_v1 }
 0x142   : > { %865 = vst.msk [vmem:[%s1579_s22 + $0x54] sm:$0xf] %vm843_vm0, %v1061_v61 }
 0x143   : > { %v689_v8 = vmax.f32 %v581_v4, 0.0  ;;  %v705_v9 = vmax.f32 %v645_v5, 0.0  ;;  %v584_v10 = vadd.f32 %v1111_v6, %v1570_v50  ;;  %v648_v11 = vadd.f32 %v1159_v7, %v1570_v50 }
 0x145   : > { %v1046_v12 = vpack.c.bf16 %v689_v8, %v689_v8  ;;  %v1062_v13 = vpack.c.bf16 %v705_v9, %v705_v9  ;;  %v690_v14 = vmax.f32 %v584_v10, 0.0  ;;  %v706_v15 = vmax.f32 %v648_v11, 0.0  ;;  %v1112_v16 = vpop.f32.mrb[16].mxu0  ;;  %v1160_v17 = vpop.f32.mrb[16].mxu1 }
 0x146   : > { %v1113_v18 = vpop.f32.mrb[17].mxu0  ;;  %v1161_v19 = vpop.f32.mrb[17].mxu1 }
 0x147   : > { %850 = vst.msk [vmem:[%s1579_s22 + $0x18] sm:$0xf] %vm843_vm0, %v1046_v12  ;;  %866 = vst.msk [vmem:[%s1579_s22 + $0x58] sm:$0xf] %vm843_vm0, %v1062_v13  ;;  %v1047_v20 = vpack.c.bf16 %v690_v14, %v690_v14  ;;  %v1063_v21 = vpack.c.bf16 %v706_v15, %v706_v15  ;;  %v1114_v22 = vadd.f32 %v1113_v18, %v1112_v16  ;;  %v1115_v24 = vpop.f32.mrb[18].mxu0  ;;  %v1163_v25 = vpop.f32.mrb[18].mxu1 }
 0x148   : > { %v1162_v23 = vadd.f32 %v1161_v19, %v1160_v17  ;;  %v1116_v26 = vpop.f32.mrb[19].mxu0  ;;  %v1164_v27 = vpop.f32.mrb[19].mxu1 }
 0x149   : > { %851 = vst.msk [vmem:[%s1579_s22 + $0x1c] sm:$0xf] %vm843_vm0, %v1047_v20  ;;  %867 = vst.msk [vmem:[%s1579_s22 + $0x5c] sm:$0xf] %vm843_vm0, %v1063_v21  ;;  %v589_v28 = vadd.f32 %v1114_v22, %v1570_v50  ;;  %v1117_v30 = vadd.f32 %v1116_v26, %v1115_v24  ;;  %v1165_v31 = vadd.f32 %v1164_v27, %v1163_v25 }
 0x14a   : > { %v653_v29 = vadd.f32 %v1162_v23, %v1570_v50 }
 0x14b   : > { %v691_v32 = vmax.f32 %v589_v28, 0.0  ;;  %v592_v34 = vadd.f32 %v1117_v30, %v1570_v50  ;;  %v656_v35 = vadd.f32 %v1165_v31, %v1570_v50 }
 0x14c   : > { %v707_v33 = vmax.f32 %v653_v29, 0.0 }
 0x14d   : > { %v1048_v36 = vpack.c.bf16 %v691_v32, %v691_v32  ;;  %v692_v38 = vmax.f32 %v592_v34, 0.0  ;;  %v708_v39 = vmax.f32 %v656_v35, 0.0  ;;  %v1118_v40 = vpop.f32.mrb[20].mxu0  ;;  %v1166_v41 = vpop.f32.mrb[20].mxu1 }
 0x14e   : > { %v1064_v37 = vpack.c.bf16 %v707_v33, %v707_v33  ;;  %v1119_v42 = vpop.f32.mrb[21].mxu0  ;;  %v1167_v43 = vpop.f32.mrb[21].mxu1 }
 0x14f   : > { %852 = vst.msk [vmem:[%s1579_s22 + $0x20] sm:$0xf] %vm843_vm0, %v1048_v36  ;;  %v1049_v44 = vpack.c.bf16 %v692_v38, %v692_v38  ;;  %v1065_v45 = vpack.c.bf16 %v708_v39, %v708_v39  ;;  %v1120_v46 = vadd.f32 %v1119_v42, %v1118_v40  ;;  %v1168_v47 = vadd.f32 %v1167_v43, %v1166_v41  ;;  %v1121_v48 = vpop.f32.mrb[22].mxu0  ;;  %v1169_v49 = vpop.f32.mrb[22].mxu1 }
 0x150   : > { %868 = vst.msk [vmem:[%s1579_s22 + $0x60] sm:$0xf] %vm843_vm0, %v1064_v37  ;;  %v1122_v51 = vpop.f32.mrb[23].mxu0  ;;  %v1170_v52 = vpop.f32.mrb[23].mxu1 }
 0x151   : > { %853 = vst.msk [vmem:[%s1579_s22 + $0x24] sm:$0xf] %vm843_vm0, %v1049_v44  ;;  %869 = vst.msk [vmem:[%s1579_s22 + $0x64] sm:$0xf] %vm843_vm0, %v1065_v45  ;;  %v597_v53 = vadd.f32 %v1120_v46, %v1570_v50  ;;  %v661_v54 = vadd.f32 %v1168_v47, %v1570_v50  ;;  %v1123_v55 = vadd.f32 %v1122_v51, %v1121_v48 }
 0x152   : > { %v1171_v56 = vadd.f32 %v1170_v52, %v1169_v49 }
 0x153   : > { %v693_v57 = vmax.f32 %v597_v53, 0.0  ;;  %v709_v58 = vmax.f32 %v661_v54, 0.0  ;;  %v600_v59 = vadd.f32 %v1123_v55, %v1570_v50 }
 0x154   : > { %v664_v60 = vadd.f32 %v1171_v56, %v1570_v50 }
 0x155   : > { %v1050_v61 = vpack.c.bf16 %v693_v57, %v693_v57  ;;  %v1066_v62 = vpack.c.bf16 %v709_v58, %v709_v58  ;;  %v694_v63 = vmax.f32 %v600_v59, 0.0  ;;  %v1124_v1 = vpop.f32.mrb[24].mxu0  ;;  %v1172_v2 = vpop.f32.mrb[24].mxu1 }
 0x156   : > { %v710_v0 = vmax.f32 %v664_v60, 0.0  ;;  %v1125_v3 = vpop.f32.mrb[25].mxu0  ;;  %v1173_v4 = vpop.f32.mrb[25].mxu1 }
 0x157   : > { %854 = vst.msk [vmem:[%s1579_s22 + $0x28] sm:$0xf] %vm843_vm0, %v1050_v61  ;;  %870 = vst.msk [vmem:[%s1579_s22 + $0x68] sm:$0xf] %vm843_vm0, %v1066_v62  ;;  %v1051_v5 = vpack.c.bf16 %v694_v63, %v694_v63  ;;  %v1126_v7 = vadd.f32 %v1125_v3, %v1124_v1  ;;  %v1174_v8 = vadd.f32 %v1173_v4, %v1172_v2  ;;  %v1127_v9 = vpop.f32.mrb[26].mxu0  ;;  %v1175_v10 = vpop.f32.mrb[26].mxu1 }
 0x158   : > { %v1067_v6 = vpack.c.bf16 %v710_v0, %v710_v0  ;;  %v1128_v11 = vpop.f32.mrb[27].mxu0  ;;  %v1176_v12 = vpop.f32.mrb[27].mxu1 }
 0x159   : > { %855 = vst.msk [vmem:[%s1579_s22 + $0x2c] sm:$0xf] %vm843_vm0, %v1051_v5  ;;  %v605_v13 = vadd.f32 %v1126_v7, %v1570_v50  ;;  %v669_v14 = vadd.f32 %v1174_v8, %v1570_v50  ;;  %v1129_v15 = vadd.f32 %v1128_v11, %v1127_v9  ;;  %v1177_v16 = vadd.f32 %v1176_v12, %v1175_v10 }
 0x15a   : > { %871 = vst.msk [vmem:[%s1579_s22 + $0x6c] sm:$0xf] %vm843_vm0, %v1067_v6 }
 0x15b   : > { %v695_v17 = vmax.f32 %v605_v13, 0.0  ;;  %v711_v18 = vmax.f32 %v669_v14, 0.0  ;;  %v608_v19 = vadd.f32 %v1129_v15, %v1570_v50  ;;  %v672_v20 = vadd.f32 %v1177_v16, %v1570_v50 }
 0x15d   : > { %v1052_v21 = vpack.c.bf16 %v695_v17, %v695_v17  ;;  %v1068_v22 = vpack.c.bf16 %v711_v18, %v711_v18  ;;  %v696_v23 = vmax.f32 %v608_v19, 0.0  ;;  %v712_v24 = vmax.f32 %v672_v20, 0.0  ;;  %v1130_v25 = vpop.f32.mrb[28].mxu0  ;;  %v1178_v26 = vpop.f32.mrb[28].mxu1 }
 0x15e   : > { %v1131_v27 = vpop.f32.mrb[29].mxu0  ;;  %v1179_v28 = vpop.f32.mrb[29].mxu1 }
 0x15f   : > { %856 = vst.msk [vmem:[%s1579_s22 + $0x30] sm:$0xf] %vm843_vm0, %v1052_v21  ;;  %872 = vst.msk [vmem:[%s1579_s22 + $0x70] sm:$0xf] %vm843_vm0, %v1068_v22  ;;  %v1053_v29 = vpack.c.bf16 %v696_v23, %v696_v23  ;;  %v1069_v30 = vpack.c.bf16 %v712_v24, %v712_v24  ;;  %v1132_v31 = vadd.f32 %v1131_v27, %v1130_v25  ;;  %v1133_v33 = vpop.f32.mrb[30].mxu0  ;;  %v1181_v34 = vpop.f32.mrb[30].mxu1 }
 0x160   : > { %v1180_v32 = vadd.f32 %v1179_v28, %v1178_v26  ;;  %v1134_v35 = vpop.f32.mrb[31].mxu0  ;;  %v1182_v36 = vpop.f32.mrb[31].mxu1 }
 0x161   : > { %857 = vst.msk [vmem:[%s1579_s22 + $0x34] sm:$0xf] %vm843_vm0, %v1053_v29  ;;  %873 = vst.msk [vmem:[%s1579_s22 + $0x74] sm:$0xf] %vm843_vm0, %v1069_v30  ;;  %v613_v37 = vadd.f32 %v1132_v31, %v1570_v50  ;;  %v1135_v39 = vadd.f32 %v1134_v35, %v1133_v33  ;;  %v1183_v40 = vadd.f32 %v1182_v36, %v1181_v34 }
 0x162   : > { %v677_v38 = vadd.f32 %v1180_v32, %v1570_v50 }
 0x163   : > { %v697_v41 = vmax.f32 %v613_v37, 0.0  ;;  %v616_v43 = vadd.f32 %v1135_v39, %v1570_v50  ;;  %v680_v44 = vadd.f32 %v1183_v40, %v1570_v50 }
 0x164   : > { %v713_v42 = vmax.f32 %v677_v38, 0.0 }
 0x165   : > { %v1054_v45 = vpack.c.bf16 %v697_v41, %v697_v41  ;;  %v698_v47 = vmax.f32 %v616_v43, 0.0  ;;  %v714_v48 = vmax.f32 %v680_v44, 0.0 }
 0x166   : > { %v1070_v46 = vpack.c.bf16 %v713_v42, %v713_v42 }
 0x167   : > { %858 = vst.msk [vmem:[%s1579_s22 + $0x38] sm:$0xf] %vm843_vm0, %v1054_v45  ;;  %v1055_v49 = vpack.c.bf16 %v698_v47, %v698_v47  ;;  %v1071_v51 = vpack.c.bf16 %v714_v48, %v714_v48 }
 0x168   : > { %874 = vst.msk [vmem:[%s1579_s22 + $0x78] sm:$0xf] %vm843_vm0, %v1070_v46 }
 0x169   : > { %859 = vst.msk [vmem:[%s1579_s22 + $0x3c] sm:$0xf] %vm843_vm0, %v1055_v49  ;;  %875 = vst.msk [vmem:[%s1579_s22 + $0x7c] sm:$0xf] %vm843_vm0, %v1071_v51 }
 0x16a PF: > { %p13_p8 = scmp.ge.s32.totalorder %s1414_s17, 4   ;;  %s1693_s12 = smov %s1361_s13 }
 0x16b   : > { %s1694_s13 = smov %s1365_s14  ;;  %s1695_s14 = smov %s1424_s20 }
 0x16c   : > { %s1696_s15 = smov %s1414_s17  ;;  %15 = sbr.rel (!%p13_p8) target bundleno = 3 (0x3), region = 72 }
 0x173   :  { %898 = vsyncpa [#allocation3], 1 }
 0x174   :  { %900 = vsyncpa [#allocation3 + $0x1], 1 }

</bundles_post_ra>
